<compile_context>
chip_gen: v7x
topology: tpu7x:2x2x1
jax: 0.10.0
libtpu: 0.0.40
codegen_flags: <defaults>
</compile_context>

<pallas_src>
import functools

import jax
import jax.numpy as jnp
from jax.experimental import pallas as pl
from jax.experimental.pallas import tpu as pltpu


def _round_up(x, m):
    return (x + m - 1) // m * m


def _cdiv(a, b):
    return -(-a // b)


def _qmixer_kernel(q_ref, s_ref, w_ref, v2w_ref, v2b_ref, out_ref,
                   *, n_agents, e_pad):
    A, E = n_agents, e_pad

    s = s_ref[...]                                   # (S+1, tm) bf16 (MXU operand)
    q = q_ref[...]                                   # (A, tm)   f32  (elementwise)

    # One wide MXU pass for all four state-side hypernet linears (biases folded
    # via the appended ones-row of s). Rows of z, in E-row sublane-aligned slabs:
    #   [ w1 slab_0 .. slab_{A-1} | b1 | w_final | V-hidden ]
    z = jnp.dot(w_ref[...], s, preferred_element_type=jnp.float32)   # (P, tm) f32

    b1 = z[A * E:(A + 1) * E, :]                          # hyper_b_1(states)
    wf = jnp.abs(z[(A + 1) * E:(A + 2) * E, :])           # |hyper_w_final(states)|
    hv = jnp.maximum(z[(A + 2) * E:(A + 3) * E, :], 0.0)  # relu(V[0](states))

    # hidden = bmm(agent_qs, |w1|) + b1 : per-agent sublane-aligned slabs, the
    # q row broadcasts along sublanes (cheap splat), pure VPU multiply-adds.
    hidden = b1
    for a in range(A):                    # A is small & static -> unrolled
        hidden = hidden + q[a:a + 1, :] * jnp.abs(z[a * E:(a + 1) * E, :])

    # ELU(alpha=1), single-exp negative branch: exp is clamped to <= 0 so it
    # never overflows; |expm1(x) - (exp(x)-1)| ~ 1e-7 near 0, well in tolerance.
    neg = jnp.exp(jnp.minimum(hidden, 0.0)) - 1.0
    hidden = jnp.where(hidden > 0.0, hidden, neg)

    # y = bmm(hidden, w_final) + V(states); V's 1-wide head folded into the same
    # sublane reduction. Result is a lane-dense (1, tm) row.
    y = jnp.sum(hidden * wf + hv * v2w_ref[...], axis=0, keepdims=True)
    out_ref[...] = (y + v2b_ref[0]).astype(out_ref.dtype)


def pack_qmixer_params(params):
    """Pack the four state-side hypernet linears feature-major, ONCE.

    Returns:
      w_pack : ((A+3)*EP, S+1) bf16 -- rows are output features, last column is
               the bias (consumed by the ones-row appended to states^T).
      v2w    : (EP, 1) f32          -- V[2] weight as a sublane column.
      v2b    : (1,) f32             -- V[2] bias (SMEM scalar).
    """
    (w1w, w1b, b1w, b1b, wfw, wfb, v1w, v1b, v2w, v2b) = params
    E = b1w.shape[1]
    A = w1w.shape[1] // E
    EP = _round_up(E, 8)                  # sublane-aligned slabs (no lane padding)

    def slab(w, b):
        rows = jnp.concatenate([w.T, b.T], axis=1)        # (E, S+1)
        return jnp.pad(rows, ((0, EP - E), (0, 0)))        # (EP, S+1)

    # torch view order for hyper_w_1: flat output index = a*E + e.
    slabs = [slab(w1w[:, a * E:(a + 1) * E], w1b[:, a * E:(a + 1) * E])
             for a in range(A)]
    slabs += [slab(b1w, b1b), slab(wfw, wfb), slab(v1w, v1b)]
    w_pack = jnp.concatenate(slabs, axis=0).astype(jnp.bfloat16)   # ((A+3)*EP, S+1)

    v2w_col = jnp.pad(v2w, ((0, EP - E), (0, 0))).astype(jnp.float32)  # (EP, 1)
    v2b_vec = v2b.reshape(-1).astype(jnp.float32)                       # (1,)
    return w_pack, v2w_col, v2b_vec


@functools.partial(jax.jit, static_argnames=("tile_rows",))
def qmixer_forward(agent_qs, states, packed, *, tile_rows=512):
    """agent_qs: (bs, T, n_agents), states: (bs, T, state_dim) -> (bs, T, 1)."""
    w_pack, v2w_col, v2b_vec = packed
    bs, T, A = agent_qs.shape
    S = states.shape[-1]
    B = bs * T
    EP = v2w_col.shape[0]
    P = w_pack.shape[0]
    assert P == (A + 3) * EP and w_pack.shape[1] == S + 1

    # Lane tiles (multiples of 128); force >=2 tiles for mid/large B so the
    # "parallel" grid axis can shard across both v7x TensorCores.
    tm_cap = max(128, _round_up(tile_rows, 128))
    tm = max(128, min(tm_cap, _round_up(_cdiv(B, 2), 128)))
    b_pad = _round_up(B, tm)
    num_tiles = b_pad // tm

    # Feature-major inputs: one small fused pass under jit (transpose + ones row
    # + bf16 cast for the MXU operand); zero-padded tail columns are discarded.
    q_t = agent_qs.reshape(B, A).astype(jnp.float32).T              # (A, B) f32
    s_aug = jnp.concatenate(
        [states.reshape(B, S), jnp.ones((B, 1), states.dtype)], axis=1)
    s_t = s_aug.T.astype(jnp.bfloat16)                              # (S+1, B) bf16
    if b_pad != B:
        q_t = jnp.pad(q_t, ((0, 0), (0, b_pad - B)))
        s_t = jnp.pad(s_t, ((0, 0), (0, b_pad - B)))

    kernel = functools.partial(_qmixer_kernel, n_agents=A, e_pad=EP)

    out = pl.pallas_call(
        kernel,
        out_shape=jax.ShapeDtypeStruct((1, b_pad), jnp.float32),
        grid_spec=pltpu.PrefetchScalarGridSpec(
            num_scalar_prefetch=0,
            grid=(num_tiles,),
            in_specs=[
                pl.BlockSpec((A, tm), lambda i: (0, i)),        # agent_qs^T tile
                pl.BlockSpec((S + 1, tm), lambda i: (0, i)),    # states^T tile
                pl.BlockSpec((P, S + 1), lambda i: (0, 0)),     # packed hypernet W
                pl.BlockSpec((EP, 1), lambda i: (0, 0)),        # V[2] weight column
                pl.BlockSpec(memory_space=pltpu.MemorySpace.SMEM),  # V[2] bias
            ],
            out_specs=pl.BlockSpec((1, tm), lambda i: (0, i)),  # lane-dense row
        ),
        compiler_params=pltpu.CompilerParams(
            dimension_semantics=("parallel",)),
    )(q_t, s_t, w_pack, v2w_col, v2b_vec)

    return out[0, :B].reshape(bs, T, 1)


def make_params(key, state_dim, n_agents, embed_dim):
    """Deterministic synthetic parameters, stored as (in, out) matrices."""
    ks = jax.random.split(key, 10)

    def lin(kw, kb, fin, fout):
        bound = 1.0 / jnp.sqrt(fin)
        w = jax.random.uniform(kw, (fin, fout), jnp.float32, -bound, bound)
        b = jax.random.uniform(kb, (1, fout), jnp.float32, -bound, bound)
        return w, b

    w1w, w1b = lin(ks[0], ks[1], state_dim, embed_dim * n_agents)   # hyper_w_1
    b1w, b1b = lin(ks[2], ks[3], state_dim, embed_dim)              # hyper_b_1
    wfw, wfb = lin(ks[4], ks[5], state_dim, embed_dim)              # hyper_w_final
    v1w, v1b = lin(ks[6], ks[7], state_dim, embed_dim)              # V[0]
    v2w, v2b = lin(ks[8], ks[9], embed_dim, 1)                      # V[2]
    return (w1w, w1b, b1w, b1b, wfw, wfb, v1w, v1b, v2w, v2b)


def qmixer_reference(agent_qs, states, params):
    """Pure-JAX reference mirroring the PyTorch forward (f32, highest matmul
    precision so the comparison isolates the kernel's own error)."""
    (w1w, w1b, b1w, b1b, wfw, wfb, v1w, v1b, v2w, v2b) = params
    bs, T, A = agent_qs.shape
    S = states.shape[-1]
    E = b1w.shape[1]
    with jax.default_matmul_precision("highest"):
        st = states.reshape(-1, S)
        q = agent_qs.reshape(-1, 1, A)
        w1 = jnp.abs(st @ w1w + w1b).reshape(-1, A, E)
        b1 = (st @ b1w + b1b).reshape(-1, 1, E)
        hid = jax.nn.elu(jnp.einsum('bia,bae->bie', q, w1) + b1)
        wf = jnp.abs(st @ wfw + wfb).reshape(-1, E, 1)
        v = (jnp.maximum(st @ v1w + v1b, 0.0) @ v2w + v2b).reshape(-1, 1, 1)
        y = jnp.einsum('bie,bej->bij', hid, wf) + v
    return y.reshape(bs, -1, 1)


def _bf16_round(x):
    return x.astype(jnp.bfloat16).astype(jnp.float32)


def _quantized_reference_inputs(states, params):
    """Mirror the kernel's bf16 MXU operands (state-side weights AND their
    biases, which are folded into the bf16 matmul) so the reference matches."""
    p = list(params)
    for idx in range(8):            # w1w,w1b,b1w,b1b,wfw,wfb,v1w,v1b
        p[idx] = _bf16_round(p[idx])
    return _bf16_round(states), tuple(p)


if __name__ == "__main__":
    n_agents, state_dim, embed_dim = 4, 32, 32
    key = jax.random.PRNGKey(0)
    k_p, k1, k2, k3, k4, k5, k6 = jax.random.split(key, 7)
    params = make_params(k_p, state_dim, n_agents, embed_dim)
    packed = pack_qmixer_params(params)     # packed ONCE, outside the hot path

    def run_case(kq, ks, bs, T):
        agent_qs = jax.random.normal(kq, (bs, T, n_agents), jnp.float32)
        states = jax.random.normal(ks, (bs, T, state_dim), jnp.float32)
        q_tot = jax.block_until_ready(qmixer_forward(agent_qs, states, packed))
        st_q, params_q = _quantized_reference_inputs(states, params)
        ref = qmixer_reference(agent_qs, st_q, params_q)
        assert q_tot.shape == (bs, T, 1)
        err = float(jnp.max(jnp.abs(q_tot - ref)))
        assert jnp.allclose(q_tot, ref, atol=2e-3, rtol=2e-3), err

    # TODO(synk): only the default hypernet_layers == 1 path is implemented
    # (the 2-layer MLP hypernet variant is a different parameterization).

    run_case(k1, k2, 2, 8)      # B = 16  -> tm=128, single tile
    run_case(k3, k4, 4, 200)    # B = 800 -> tm=512, 2 tiles (v7x: both TCs), padded tail
    run_case(k5, k6, 3, 50)     # B = 150 -> tm=128, 2 tiles, padded tail

    print("KERNEL_OK")
</pallas_src>

<mosaic_0001>
module attributes {stable_mosaic.version = 11 : i64} {
  func.func @_qmixer_kernel(%arg0: i32, %arg1: memref<4x128xf32, #tpu.memory_space<vmem>>, %arg2: memref<33x128xbf16, #tpu.memory_space<vmem>>, %arg3: memref<224x33xbf16, #tpu.memory_space<vmem>>, %arg4: memref<32x1xf32, #tpu.memory_space<vmem>>, %arg5: memref<1xf32, #tpu.memory_space<smem>>, %arg6: memref<1x128xf32, #tpu.memory_space<vmem>>) attributes {dimension_semantics = [#tpu.dimension_semantics<parallel>], iteration_bounds = array<i64: 1>, scalar_prefetch = 0 : i64, scratch_operands = 0 : i64, tpu.core_type = #tpu.core_type<tc>, window_params = [{transform_indices = @transform_0, window_bounds = array<i64: 4, 128>}, {transform_indices = @transform_1, window_bounds = array<i64: 33, 128>}, {pipeline_mode = #tpu.pipeline_mode<synchronous>, transform_indices = @transform_2, window_bounds = array<i64: 224, 33>}, {pipeline_mode = #tpu.pipeline_mode<synchronous>, transform_indices = @transform_3, window_bounds = array<i64: 32, 1>}, {transform_indices = @transform_4, window_bounds = array<i64: 1>}, {transform_indices = @transform_5, window_bounds = array<i64: 1, 128>}]} {
    %c0 = arith.constant 0 : index
    %c0_0 = arith.constant 0 : index
    %0 = vector.load %arg2[%c0, %c0_0] : memref<33x128xbf16, #tpu.memory_space<vmem>>, vector<33x128xbf16>
    %c0_1 = arith.constant 0 : index
    %c0_2 = arith.constant 0 : index
    %1 = vector.load %arg1[%c0_1, %c0_2] : memref<4x128xf32, #tpu.memory_space<vmem>>, vector<4x128xf32>
    %c0_3 = arith.constant 0 : index
    %c0_4 = arith.constant 0 : index
    %2 = vector.load %arg3[%c0_3, %c0_4] : memref<224x33xbf16, #tpu.memory_space<vmem>>, vector<224x33xbf16>
    %cst = arith.constant dense<0.000000e+00> : vector<224x128xf32>
    %3 = tpu.matmul %2, %0, %cst {dimension_numbers = #tpu.dot_dimension_numbers<[1], [0], [0], [1], [0, 0, 1, 1], [], []>} : vector<224x33xbf16>, vector<33x128xbf16>, vector<224x128xf32> -> vector<224x128xf32>
    %4 = vector.extract_strided_slice %3 {offsets = [128, 0], sizes = [32, 128], strides = [1, 1]} : vector<224x128xf32> to vector<32x128xf32>
    %5 = vector.extract_strided_slice %3 {offsets = [160, 0], sizes = [32, 128], strides = [1, 1]} : vector<224x128xf32> to vector<32x128xf32>
    %6 = math.absf %5 : vector<32x128xf32>
    %7 = vector.extract_strided_slice %3 {offsets = [192, 0], sizes = [32, 128], strides = [1, 1]} : vector<224x128xf32> to vector<32x128xf32>
    %cst_5 = arith.constant 0.000000e+00 : f32
    %8 = vector.broadcast %cst_5 : f32 to vector<32x128xf32>
    %9 = arith.maximumf %7, %8 : vector<32x128xf32>
    %10 = vector.extract_strided_slice %1 {offsets = [0, 0], sizes = [1, 128], strides = [1, 1]} : vector<4x128xf32> to vector<1x128xf32>
    %11 = vector.extract_strided_slice %3 {offsets = [0, 0], sizes = [32, 128], strides = [1, 1]} : vector<224x128xf32> to vector<32x128xf32>
    %12 = math.absf %11 : vector<32x128xf32>
    %13 = vector.broadcast %10 : vector<1x128xf32> to vector<32x128xf32>
    %14 = arith.mulf %13, %12 : vector<32x128xf32>
    %15 = arith.addf %4, %14 : vector<32x128xf32>
    %16 = vector.extract_strided_slice %1 {offsets = [1, 0], sizes = [1, 128], strides = [1, 1]} : vector<4x128xf32> to vector<1x128xf32>
    %17 = vector.extract_strided_slice %3 {offsets = [32, 0], sizes = [32, 128], strides = [1, 1]} : vector<224x128xf32> to vector<32x128xf32>
    %18 = math.absf %17 : vector<32x128xf32>
    %19 = vector.broadcast %16 : vector<1x128xf32> to vector<32x128xf32>
    %20 = arith.mulf %19, %18 : vector<32x128xf32>
    %21 = arith.addf %15, %20 : vector<32x128xf32>
    %22 = vector.extract_strided_slice %1 {offsets = [2, 0], sizes = [1, 128], strides = [1, 1]} : vector<4x128xf32> to vector<1x128xf32>
    %23 = vector.extract_strided_slice %3 {offsets = [64, 0], sizes = [32, 128], strides = [1, 1]} : vector<224x128xf32> to vector<32x128xf32>
    %24 = math.absf %23 : vector<32x128xf32>
    %25 = vector.broadcast %22 : vector<1x128xf32> to vector<32x128xf32>
    %26 = arith.mulf %25, %24 : vector<32x128xf32>
    %27 = arith.addf %21, %26 : vector<32x128xf32>
    %28 = vector.extract_strided_slice %1 {offsets = [3, 0], sizes = [1, 128], strides = [1, 1]} : vector<4x128xf32> to vector<1x128xf32>
    %29 = vector.extract_strided_slice %3 {offsets = [96, 0], sizes = [32, 128], strides = [1, 1]} : vector<224x128xf32> to vector<32x128xf32>
    %30 = math.absf %29 : vector<32x128xf32>
    %31 = vector.broadcast %28 : vector<1x128xf32> to vector<32x128xf32>
    %32 = arith.mulf %31, %30 : vector<32x128xf32>
    %33 = arith.addf %27, %32 : vector<32x128xf32>
    %cst_6 = arith.constant 0.000000e+00 : f32
    %34 = vector.broadcast %cst_6 : f32 to vector<32x128xf32>
    %35 = arith.minimumf %33, %34 : vector<32x128xf32>
    %36 = math.exp %35 : vector<32x128xf32>
    %cst_7 = arith.constant 1.000000e+00 : f32
    %37 = vector.broadcast %cst_7 : f32 to vector<32x128xf32>
    %38 = arith.subf %36, %37 : vector<32x128xf32>
    %cst_8 = arith.constant 0.000000e+00 : f32
    %39 = vector.broadcast %cst_8 : f32 to vector<32x128xf32>
    %40 = arith.cmpf ogt, %33, %39 : vector<32x128xf32>
    %41 = arith.select %40, %33, %38 : vector<32x128xi1>, vector<32x128xf32>
    %42 = arith.mulf %41, %6 : vector<32x128xf32>
    %c0_9 = arith.constant 0 : index
    %c0_10 = arith.constant 0 : index
    %43 = vector.load %arg4[%c0_9, %c0_10] : memref<32x1xf32, #tpu.memory_space<vmem>>, vector<32x1xf32>
    %44 = vector.broadcast %43 : vector<32x1xf32> to vector<32x128xf32>
    %45 = arith.mulf %9, %44 : vector<32x128xf32>
    %46 = arith.addf %42, %45 : vector<32x128xf32>
    %cst_11 = arith.constant dense<0.000000e+00> : vector<128xf32>
    %47 = vector.multi_reduction <add>, %46, %cst_11 [0] : vector<32x128xf32> to vector<128xf32>
    %48 = vector.shape_cast %47 : vector<128xf32> to vector<1x128xf32>
    %c0_12 = arith.constant 0 : index
    %49 = memref.load %arg5[%c0_12] : memref<1xf32, #tpu.memory_space<smem>>
    %50 = vector.broadcast %49 : f32 to vector<1x128xf32>
    %51 = arith.addf %48, %50 : vector<1x128xf32>
    %c0_13 = arith.constant 0 : index
    %c0_14 = arith.constant 0 : index
    %52 = vector.load %arg6[%c0_13, %c0_14] : memref<1x128xf32, #tpu.memory_space<vmem>>, vector<1x128xf32>
    tpu.vector_store %arg6[%c0_13, %c0_14], %51 {strides = array<i32>} : memref<1x128xf32, #tpu.memory_space<vmem>>, vector<1x128xf32>,
    return
  }
  func.func @transform_0(%arg0: i32) -> (i32, i32) {
    %c0_i32 = arith.constant 0 : i32
    %c0_i32_0 = arith.constant 0 : i32
    return %c0_i32, %arg0 : i32, i32
  }
  func.func @transform_1(%arg0: i32) -> (i32, i32) {
    %c0_i32 = arith.constant 0 : i32
    %c0_i32_0 = arith.constant 0 : i32
    return %c0_i32, %arg0 : i32, i32
  }
  func.func @transform_2(%arg0: i32) -> (i32, i32) {
    %c0_i32 = arith.constant 0 : i32
    %c0_i32_0 = arith.constant 0 : i32
    %c0_i32_1 = arith.constant 0 : i32
    return %c0_i32, %c0_i32_0 : i32, i32
  }
  func.func @transform_3(%arg0: i32) -> (i32, i32) {
    %c0_i32 = arith.constant 0 : i32
    %c0_i32_0 = arith.constant 0 : i32
    %c0_i32_1 = arith.constant 0 : i32
    return %c0_i32, %c0_i32_0 : i32, i32
  }
  func.func @transform_4(%arg0: i32) -> i32 {
    %c0_i32 = arith.constant 0 : i32
    %c0_i32_0 = arith.constant 0 : i32
    return %c0_i32 : i32
  }
  func.func @transform_5(%arg0: i32) -> (i32, i32) {
    %c0_i32 = arith.constant 0 : i32
    %c0_i32_0 = arith.constant 0 : i32
    return %c0_i32, %arg0 : i32, i32
  }
}

</mosaic_0001>

<bundles_post_ra>
// kernel: squeeze.1
= control target key start
LH: loop header
LB: loop body
LE: loop exit
PB: predicated region body
PF: predicated region fallthrough
CT: control target
= control target key end

     0   :  { %s85_s0 = inlined_call_operand.vmem [shape: f32[16], index: 0, kind: input, shape index: {}]   ;;  %s86_s1 = inlined_call_operand.hbm [shape: f32[2,8,1], index: 1, kind: output, shape index: {}]  }
   0x1   :  { %v5_v0 = vld [vmem:[%s85_s0] sm:$0x1] }
   0x2   :  { %2 = vsyncpa [#allocation1], 0  ;;  %6 = vst [vmem:[#allocation3] sm:$0x1] %v5_v0  ;;  %vm8_vm0 = vcmask 64512   ;;  %s58_s0 = smov 120  }
   0x3   :  { %s59_s8 = smov [#allocation0]  }
   0x4   :  { %s26_s9 = sshll.u32 %s59_s8, 4  ;;  %s27_s9 = int_to_ptr.vmem [resolvable:$true] %s26_s9 }
   0x5   :  { %s34_s10 = scalar_lea.vmem %s27_s9, 32  ;;  %p39_p1 = scmp.lt.s32.totalorder %s27_s9, %s27_s9 }
   0x6   :  { %p35_p0 = scmp.ne.s32.totalorder %s27_s9, %s34_s10  ;;  %p40_p2 = scmp.lt.s32.totalorder %s34_s10, %s34_s10 }
   0x8   :  { %p41_p3 = por %p40_p2, %p39_p1 }
   0x9   :  { %v10_v1 = vld [vmem:[#allocation3] sm:$0x1]  }
   0xa   :  { %v7_v2 = vld [vmem:[#allocation3] sm:$0x1]   ;;  %11 = vrot.lane.b32.xlu0 %v10_v1, %s58_s0  ;;  %p42_p4 = pnand %p41_p3, %p35_p0 }
   0xb   :  { %9 = vst.msk [vmem:[#allocation2] sm:$0x1] %vm8_vm0, %v7_v2  }
  0x7c   :  { %v12_v3 = vpop.permute.xlu0 %11  }
  0x7d   :  { %15 = vst.msk [vmem:[#allocation2 + $0x1] sm:$0x1] %vm8_vm0, %v12_v3  }
  0x84   :  { %v19_v4 = vld [vmem:[#allocation2] sm:$0x3] }
  0x85   :  { %21 = vst [vmem:[#allocation0] sm:$0x3] %v19_v4 }
  0x86   :  { %45 = shalt.err (!%p42_p4)
}
  0x87   :  { %s46_s13 = scalar_lea.hbm %s86_s1, 32 }
  0x88   :  { %p47_p5 = scmp.ne.s32.totalorder %s86_s1, %s46_s13  ;;  %p50_p6 = scmp.lt.u32.totalorder %s46_s13, %s86_s1 }
  0x8a   :  { %p52_p7 = pnand %p50_p6, %p47_p5 }
  0x8c   :  { %55 = shalt.err (!%p52_p7)
}
  0x8d   :  { %29 = dma.vmem_to_hbm [thread:$0]  %s27_s9, 32, %s86_s1, [#allocation1]  }
  0x8e   :  { %56 = dma.done.wait [#allocation1], 32  }
  0x8f   :  { %57 = vsyncadd [#allocation1], 4294967264 }
  0x90   :  { %31 = vsyncpa [#allocation1], 1 }

// kernel: qmixer_forward.1
= control target key start
LH: loop header
LB: loop body
LE: loop exit
PB: predicated region body
PF: predicated region fallthrough
CT: control target
= control target key end

     0   :  { %vm184_vm0 = vcmask 1040384   ;;  %vm141_vm1 = vcmask 269312   ;;  %v604_v1 = vmov 0   ;;  %v347_v24 = vlaneseq  ;;  %s757_s1 = inlined_call_operand.vmem [shape: bf16[33,128], index: 1, kind: input, shape index: {}]   ;;  %s758_s2 = inlined_call_operand.vmem [shape: bf16[224,33], index: 2, kind: input, shape index: {}]   ;;  %s759_s3 = inlined_call_operand.vmem [shape: f32[32,1], index: 3, kind: input, shape index: {}]   ;;  %s760_s0 = inlined_call_operand.vmem [shape: f32[4,128], index: 0, kind: input, shape index: {}]   ;;  %s761_s4 = inlined_call_operand.<no memory space> [shape: f32[1], index: 4, kind: input, shape index: {}]   ;;  %s762_s5 = inlined_call_operand.vmem [shape: f32[1,128], index: 5, kind: output, shape index: {}]  }
   0x1   :  { %v579_v0 = vld [vmem:[%s757_s1] sm:$0xff]   ;;  %577 = vset.pattern.permute.xlu0 %v604_v1  ;;  %578 = vset.pattern.permute.xlu1 %v604_v1  ;;  %v580_v2 = vld [vmem:[%s757_s1 + $0x8] sm:$0xff]   ;;  %v186_v3 = vsel %vm184_vm0, 65535, %v604_v1  ;;  %v581_v4 = vld [vmem:[%s757_s1 + $0x10] ss:$0 sps:$4 sm:$0x11]  }
   0x2   :  { %536 = vmatprep.subr.bf16.mxu0 %v579_v0  ;;  %570 = vmatprep.subr.bf16.mxu1 %v579_v0  ;;  %v582_v5 = vld [vmem:[%s758_s2] sm:$0xff]   ;;  %v188_v6 = vand.u32 %v581_v4, %v186_v3  ;;  %v583_v8 = vld [vmem:[%s758_s2 + $0x8] sm:$0xff]   ;;  %v586_v10 = vld [vmem:[%s758_s2 + $0x10] sm:$0xff]   ;;  %v712_v25 = vshrl.u32 %v347_v24, 7 }
   0x3   :  { %537 = vmatpush3.bf16.msra.mxu0 %v579_v0  ;;  %573 = vmatpush3.bf16.msra.mxu1 %v579_v0  ;;  %v584_v7 = vld [vmem:[%s758_s2 + $0x40] sm:$0xff]   ;;  %v585_v9 = vld [vmem:[%s758_s2 + $0x48] sm:$0xff]   ;;  %v592_v11 = vld [vmem:[%s758_s2 + $0x50] sm:$0xff]  }
   0x4   :  { %538 = vmatprep.subr.bf16.mxu0 %v580_v2  ;;  %571 = vmatprep.subr.bf16.mxu1 %v580_v2  ;;  %v435_v12 = vld [vmem:[%s759_s3] sm:$0xff]  ;;  %v437_v13 = vld [vmem:[%s759_s3 + $0x10] sm:$0xff]  ;;  %v587_v14 = vld [vmem:[%s758_s2 + $0x18] sm:$0xff]   ;;  %v349_v26 = vsub.s32 0, %v712_v25  ;;  %v365_v41 = vsub.s32 1, %v712_v25  ;;  %v381_v62 = vsub.s32 2, %v712_v25 }
   0x5   :  { %542 = vmatprep.mubr.msk.bf16.mxu0 %vm141_vm1, %v582_v5  ;;  %558 = vmatprep.mubr.msk.bf16.mxu1 %vm141_vm1, %v584_v7  ;;  %v593_v15 = vld [vmem:[%s758_s2 + $0x58] sm:$0xff]   ;;  %v436_v16 = vld [vmem:[%s759_s3 + $0x8] sm:$0xff]  ;;  %v588_v17 = vld [vmem:[%s758_s2 + $0x20] sm:$0xff]  }
   0x6   :  { %441 = vperm.xlu0 %577, %v435_v12   ;;  %451 = vperm.xlu1 %578, %v437_v13   ;;  %v594_v18 = vld [vmem:[%s758_s2 + $0x60] sm:$0xff]   ;;  %v438_v19 = vld [vmem:[%s759_s3 + $0x18] sm:$0xff]  ;;  %v589_v20 = vld [vmem:[%s758_s2 + $0x28] sm:$0xff]  }
   0x7   :  { %539 = vmatpush3.bf16.msra.mxu0 %v580_v2  ;;  %574 = vmatpush3.bf16.msra.mxu1 %v580_v2  ;;  %v595_v21 = vld [vmem:[%s758_s2 + $0x68] sm:$0xff]   ;;  %v590_v22 = vld [vmem:[%s758_s2 + $0x30] sm:$0xff]   ;;  %v591_v23 = vld [vmem:[%s758_s2 + $0x38] sm:$0xff]  }
   0x8   :  { %540 = vmatprep.subr.bf16.mxu0 %v188_v6  ;;  %572 = vmatprep.subr.bf16.mxu1 %v188_v6  ;;  %v718_v27 = vld [vmem:[%s760_s0] sm:$0xf] }
   0x9   :  { %v350_v28 = vrot.slane %v718_v27, %v349_v26  ;;  %v366_v49 = vrot.slane %v718_v27, %v365_v41  ;;  %v382_v7 = vrot.slane %v718_v27, %v381_v62 }
   0xa   :  { %446 = vperm.xlu0 %577, %v436_v16   ;;  %456 = vperm.xlu1 %578, %v438_v19  }
   0xb   :  { %541 = vmatpush3.bf16.msra.mxu0 %v188_v6  ;;  %575 = vmatpush3.bf16.msra.mxu1 %v188_v6 }
   0xe   :  { %543 = vmatmul.mubr.msk.bf16.vlgmr.msra.gmra.mrb[0].mxu0 %vm141_vm1, %v583_v8  ;;  %559 = vmatmul.mubr.msk.bf16.vlgmr.msra.gmra.mrb[0].mxu1 %vm141_vm1, %v585_v9 }
   0xf   :  { %546 = vmatprep.mubr.msk.bf16.mxu0 %vm141_vm1, %v586_v10  ;;  %562 = vmatprep.mubr.msk.bf16.mxu1 %vm141_vm1, %v592_v11 }
  0x16   :  { %547 = vmatmul.mubr.msk.bf16.gmra.mrb[4].mxu0 %vm141_vm1, %v587_v14  ;;  %563 = vmatmul.mubr.msk.bf16.gmra.mrb[4].mxu1 %vm141_vm1, %v593_v15 }
  0x17   :  { %550 = vmatprep.mubr.msk.bf16.mxu0 %vm141_vm1, %v588_v17  ;;  %566 = vmatprep.mubr.msk.bf16.mxu1 %vm141_vm1, %v594_v18 }
  0x1e   :  { %551 = vmatmul.mubr.msk.bf16.gmra.mrb[8].mxu0 %vm141_vm1, %v589_v20  ;;  %567 = vmatmul.mubr.msk.bf16.gmra.mrb[8].mxu1 %vm141_vm1, %v595_v21  ;;  %v397_v20 = vsub.s32 3, %v712_v25 }
  0x1f   :  { %554 = vmatprep.mubr.msk.bf16.mxu0 %vm141_vm1, %v590_v22 }
  0x26   :  { %555 = vmatmul.mubr.msk.bf16.gmra.mrb[12].mxu0 %vm141_vm1, %v591_v23 }
  0xe1   :  { %v544_v29 = vpop.f32.mrb[0].mxu0  ;;  %v560_v30 = vpop.f32.mrb[0].mxu1 }
  0xe2   :  { %v345_v31 = vand.u32 2147483647, %v544_v29  ;;  %v224_v32 = vpop.f32.mrb[1].mxu0  ;;  %v288_v33 = vpop.f32.mrb[1].mxu1 }
  0xe3   :  { %v343_v34 = vand.u32 2147483647, %v224_v32  ;;  %v545_v35 = vpop.f32.mrb[2].mxu0  ;;  %v561_v36 = vpop.f32.mrb[2].mxu1 }
  0xe4   :  { %v346_v37 = vand.u32 2147483647, %v545_v35  ;;  %v227_v38 = vpop.f32.mrb[3].mxu0  ;;  %v353_v39 = vmul.f32 %v350_v28, %v345_v31  ;;  %v291_v40 = vpop.f32.mrb[3].mxu1  ;;  %v398_v31 = vrot.slane %v718_v27, %v397_v20 }
  0xe5   :  { %v344_v42 = vand.u32 2147483647, %v227_v38  ;;  %v351_v43 = vmul.f32 %v350_v28, %v343_v34 }
  0xe6   :  { %v357_v44 = vadd.f32 %v560_v30, %v353_v39  ;;  %v354_v45 = vmul.f32 %v350_v28, %v346_v37 }
  0xe7   :  { %v355_v46 = vadd.f32 %v351_v43, %v288_v33  ;;  %v352_v47 = vmul.f32 %v350_v28, %v344_v42 }
  0xe8   :  { %v358_v48 = vadd.f32 %v561_v36, %v354_v45 }
  0xe9   :  { %v356_v50 = vadd.f32 %v352_v47, %v291_v40  ;;  %v548_v51 = vpop.f32.mrb[4].mxu0  ;;  %v723_v52 = vpop.f32.mrb[4].mxu1 }
  0xea   :  { %v361_v53 = vand.u32 2147483647, %v548_v51  ;;  %v240_v54 = vpop.f32.mrb[5].mxu0  ;;  %v725_v55 = vpop.f32.mrb[5].mxu1  ;;  %v337_v62 = vand.u32 2147483647, %v723_v52 }
  0xeb   :  { %v359_v56 = vand.u32 2147483647, %v240_v54  ;;  %v549_v57 = vpop.f32.mrb[6].mxu0  ;;  %v727_v58 = vpop.f32.mrb[6].mxu1 }
  0xec   :  { %v369_v59 = vmul.f32 %v366_v49, %v361_v53  ;;  %v362_v60 = vand.u32 2147483647, %v549_v57  ;;  %v243_v61 = vpop.f32.mrb[7].mxu0  ;;  %v730_v63 = vpop.f32.mrb[7].mxu1 }
  0xed   :  { %v367_v0 = vmul.f32 %v366_v49, %v359_v56  ;;  %v360_v1 = vand.u32 2147483647, %v243_v61  ;;  %v452_v57 = vpop.permute.xlu1 %451 }
  0xee   :  { %v373_v2 = vadd.f32 %v369_v59, %v357_v44  ;;  %v370_v3 = vmul.f32 %v366_v49, %v362_v60  ;;  %v442_v60 = vpop.permute.xlu0 %441 }
  0xef   :  { %v371_v4 = vadd.f32 %v367_v0, %v355_v46  ;;  %v368_v5 = vmul.f32 %v366_v49, %v360_v1  ;;  %v335_v0 = vand.u32 2147483647, %v725_v55 }
  0xf0   :  { %v374_v6 = vadd.f32 %v370_v3, %v358_v48  ;;  %v338_v3 = vand.u32 2147483647, %v727_v58 }
  0xf1   :  { %v372_v8 = vadd.f32 %v368_v5, %v356_v50  ;;  %v552_v9 = vpop.f32.mrb[8].mxu0  ;;  %v733_v10 = vpop.f32.mrb[8].mxu1 }
  0xf2   :  { %v377_v11 = vand.u32 2147483647, %v552_v9  ;;  %v256_v12 = vpop.f32.mrb[9].mxu0  ;;  %v735_v13 = vpop.f32.mrb[9].mxu1  ;;  %v341_v59 = vmax.f32 %v733_v10, 0.0 }
  0xf3   :  { %v375_v14 = vand.u32 2147483647, %v256_v12  ;;  %v553_v15 = vpop.f32.mrb[10].mxu0  ;;  %v737_v16 = vpop.f32.mrb[10].mxu1  ;;  %v339_v5 = vmax.f32 %v735_v13, 0.0 }
  0xf4   :  { %v385_v17 = vmul.f32 %v382_v7, %v377_v11  ;;  %v378_v18 = vand.u32 2147483647, %v553_v15  ;;  %v259_v19 = vpop.f32.mrb[11].mxu0  ;;  %v740_v21 = vpop.f32.mrb[11].mxu1  ;;  %v342_v9 = vmax.f32 %v737_v16, 0.0 }
  0xf5   :  { %v383_v22 = vmul.f32 %v382_v7, %v375_v14  ;;  %v376_v23 = vand.u32 2147483647, %v259_v19  ;;  %v340_v55 = vmax.f32 %v740_v21, 0.0  ;;  %v457_v12 = vpop.permute.xlu1 %456 }
  0xf6   :  { %v389_v24 = vadd.f32 %v385_v17, %v373_v2  ;;  %v386_v26 = vmul.f32 %v382_v7, %v378_v18  ;;  %v459_v18 = vmul.f32 %v442_v60, %v339_v5  ;;  %v462_v16 = vmul.f32 %v457_v12, %v342_v9 }
  0xf7   :  { %v387_v28 = vadd.f32 %v383_v22, %v371_v4  ;;  %v384_v29 = vmul.f32 %v382_v7, %v376_v23  ;;  %v336_v4 = vand.u32 2147483647, %v730_v63  ;;  %v447_v63 = vpop.permute.xlu0 %446 }
  0xf8   :  { %v390_v30 = vadd.f32 %v386_v26, %v374_v6  ;;  %v460_v26 = vmul.f32 %v447_v63, %v340_v55 }
  0xf9   :  { %v388_v32 = vadd.f32 %v384_v29, %v372_v8  ;;  %v556_v33 = vpop.f32.mrb[12].mxu0  ;;  %v461_v8 = vmul.f32 %v452_v57, %v341_v59 }
  0xfa   :  { %v393_v34 = vand.u32 2147483647, %v556_v33  ;;  %v272_v35 = vpop.f32.mrb[13].mxu0 }
  0xfb   :  { %v391_v36 = vand.u32 2147483647, %v272_v35  ;;  %v557_v37 = vpop.f32.mrb[14].mxu0 }
  0xfc   :  { %v401_v38 = vmul.f32 %v398_v31, %v393_v34  ;;  %v394_v39 = vand.u32 2147483647, %v557_v37  ;;  %v275_v25 = vpop.f32.mrb[15].mxu0  ;;  %v477_v37 = vstv %s761_s4 }
  0xfd   :  { %v399_v40 = vmul.f32 %v398_v31, %v391_v36  ;;  %v392_v41 = vand.u32 2147483647, %v275_v25 }
  0xfe   :  { %v405_v42 = vadd.f32 %v401_v38, %v389_v24  ;;  %v402_v43 = vmul.f32 %v398_v31, %v394_v39 }
  0xff   :  { %v403_v44 = vadd.f32 %v399_v40, %v387_v28  ;;  %v400_v45 = vmul.f32 %v398_v31, %v392_v41 }
 0x100   :  { %v409_v46 = vmin.f32 %v405_v42, 0.0  ;;  %v406_v47 = vadd.f32 %v402_v43, %v390_v30  ;;  %vm425_vm2 = vcmp.gt.f32.partialorder %v405_v42, 0.0 }
 0x101   :  { %v407_v48 = vmin.f32 %v403_v44, 0.0  ;;  %v404_v49 = vadd.f32 %v400_v45, %v388_v32  ;;  %vm423_vm3 = vcmp.gt.f32.partialorder %v403_v44, 0.0 }
 0x102   :  { %v415_v27 = vmul.f32 1.442695, %v409_v46  ;;  %v410_v50 = vmin.f32 %v406_v47, 0.0  ;;  %vm426_vm4 = vcmp.gt.f32.partialorder %v406_v47, 0.0 }
 0x103   :  { %v411_v51 = vmul.f32 1.442695, %v407_v48  ;;  %v408_v53 = vmin.f32 %v404_v49, 0.0  ;;  %vm424_vm5 = vcmp.gt.f32.partialorder %v404_v49, 0.0 }
 0x104   :  { %596 = vpow2.f32 %v415_v27  ;;  %v417_v54 = vmul.f32 1.442695, %v410_v50 }
 0x105   :  { %598 = vpow2.f32 %v411_v51  ;;  %v413_v56 = vmul.f32 1.442695, %v408_v53 }
 0x106   :  { %600 = vpow2.f32 %v417_v54 }
 0x107   :  { %602 = vpow2.f32 %v413_v56 }
 0x10e   :  { %v597_v61 = vpop.eup %596 }
 0x10f   :  { %v599_v1 = vpop.eup %598  ;;  %v517_v2 = vadd.f32 -1.0, %v597_v61 }
 0x110   :  { %v601_v6 = vpop.eup %600  ;;  %v515_v7 = vadd.f32 -1.0, %v599_v1 }
 0x111   :  { %v603_v10 = vpop.eup %602  ;;  %v429_v11 = vsel %vm425_vm2, %v405_v42, %v517_v2  ;;  %v518_v52 = vadd.f32 -1.0, %v601_v6 }
 0x112   :  { %v433_v14 = vmul.f32 %v429_v11, %v337_v62  ;;  %v427_v15 = vsel %vm423_vm3, %v403_v44, %v515_v7  ;;  %v516_v58 = vadd.f32 -1.0, %v603_v10 }
 0x113   :  { %v431_v17 = vmul.f32 %v427_v15, %v335_v0  ;;  %v430_v13 = vsel %vm426_vm4, %v406_v47, %v518_v52 }
 0x114   :  { %v434_v19 = vmul.f32 %v430_v13, %v338_v3  ;;  %v428_v20 = vsel %vm424_vm5, %v404_v49, %v516_v58  ;;  %v465_v22 = vadd.f32 %v461_v8, %v433_v14 }
 0x115   :  { %v432_v23 = vmul.f32 %v428_v20, %v336_v4  ;;  %v463_v24 = vadd.f32 %v459_v18, %v431_v17 }
 0x116   :  { %v466_v28 = vadd.f32 %v462_v16, %v434_v19 }
 0x117   :  { %v464_v29 = vadd.f32 %v460_v26, %v432_v23 }
 0x119   :  { %v467_v21 = vadd.f32 %v464_v29, %v463_v24 }
 0x11b   :  { %v468_v30 = vadd.f32 %v467_v21, %v465_v22 }
 0x11d   :  { %v469_v31 = vadd.f32 %v468_v30, %v466_v28 }
 0x11f   :  { %v470_v32 = vrot.slane %v469_v31, 4 }
 0x121   :  { %v471_v33 = vadd.f32 %v470_v32, %v469_v31 }
 0x123   :  { %v472_v34 = vrot.slane %v471_v33, 2 }
 0x125   :  { %v473_v35 = vadd.f32 %v472_v34, %v471_v33 }
 0x127   :  { %v474_v36 = vrot.slane %v473_v35, 1 }
 0x129   :  { %v475_v38 = vadd.f32 %v474_v36, %v473_v35 }
 0x12b   :  { %v478_v39 = vadd.f32 %v477_v37, %v475_v38 }
 0x12d   :  { %479 = vst [vmem:[%s762_s5] sm:$0x1] %v478_v39 }

</bundles_post_ra>
